<compile_context>
chip_gen: v7x
topology: tpu7x:2x2x1
jax: 0.10.0
libtpu: 0.0.40
codegen_flags: <defaults>
</compile_context>

<pallas_src>
import functools
import math

import jax
import jax.numpy as jnp
import numpy as np
from jax.experimental import pallas as pl
from jax.experimental.pallas import tpu as pltpu


def _vit_block_kernel(x_ref, gamma_ref, beta_ref,
                      wq_ref, wk_ref, wv_ref,
                      bq_ref, bk_ref, bv_ref,
                      o_ref, *, n_rows, seq_len, n_heads, d_head, eps):
    gamma = gamma_ref[0]                                   # (D,)
    beta = beta_ref[0]
    bq = bq_ref[0]                                         # (D,) -- scale pre-folded
    bk = bk_ref[0]
    bv = bv_ref[0]

    # ---- LayerNorm over last dim, whole (bt*S, D) block at once (f32, VPU) ----
    x = x_ref[...].astype(jnp.float32)                     # (bt*S, D)
    mean = jnp.mean(x, axis=-1, keepdims=True)
    xc = x - mean
    var = jnp.mean(xc * xc, axis=-1, keepdims=True)
    xn = xc * jax.lax.rsqrt(var + eps) * gamma + beta      # (bt*S, D)

    # ---- Fused q/k/v projections: block-diagonal (D, D) weights ->
    #      one lane-dense MXU matmul per projection over the whole block ----
    xn_bf = xn.astype(jnp.bfloat16)
    q = jnp.dot(xn_bf, wq_ref[...], preferred_element_type=jnp.float32) + bq
    k = jnp.dot(xn_bf, wk_ref[...], preferred_element_type=jnp.float32) + bk
    v = jnp.dot(xn_bf, wv_ref[...], preferred_element_type=jnp.float32) + bv
    q = q.astype(jnp.bfloat16)
    k = k.astype(jnp.bfloat16)
    v = v.astype(jnp.bfloat16)

    # ---- Per-(row, head) attention. Head contexts stay in vregs and are
    #      assembled with value concatenation; no masked scratch stores. ----
    row_ctx = []
    for b in range(n_rows):
        rlo = b * seq_len
        head_ctx = []
        for h in range(n_heads):
            lo = h * d_head
            qh = q[rlo:rlo + seq_len, lo:lo + d_head]      # (S, d_head) bf16
            kh = k[rlo:rlo + seq_len, lo:lo + d_head]
            vh = v[rlo:rlo + seq_len, lo:lo + d_head]

            # q @ k^T without materializing a transpose of k.
            logits = jax.lax.dot_general(
                qh, kh, (((1,), (1,)), ((), ())),
                preferred_element_type=jnp.float32)        # (S, S) f32

            # numerically-stable softmax (f32); approx reciprocal -> EUP slot
            m = jnp.max(logits, axis=-1, keepdims=True)
            p = jnp.exp(logits - m)
            attn = p * pl.reciprocal(jnp.sum(p, axis=-1, keepdims=True),
                                     approx=True)

            head_ctx.append(jnp.dot(attn.astype(jnp.bfloat16), vh,
                                    preferred_element_type=jnp.float32))
        row_ctx.append(jnp.concatenate(head_ctx, axis=-1))   # (S, D)
    ctx = row_ctx[0] if n_rows == 1 else jnp.concatenate(row_ctx, axis=0)

    # ---- residual add; x re-read here (short live range); single full store ----
    o_ref[...] = (x_ref[...].astype(jnp.float32) + ctx).astype(o_ref.dtype)


def _block_diag(w):
    """(H, d, d) per-head weights -> (H*d, H*d) block-diagonal matrix."""
    H, dh, _ = w.shape
    eye = jnp.eye(H, dtype=w.dtype)
    return jnp.einsum("hij,hg->higj", w, eye).reshape(H * dh, H * dh)


def _vmem_bytes(bt, S, D):
    """Estimated per-step VMEM footprint (bytes)."""
    blk = bt * S * D * 4
    io = 2 * 2 * blk                     # x + out blocks, double-buffered
    weights = 3 * D * D * 2 * 2          # bf16 Wq/Wk/Wv, double-buffered
    vecs = 5 * 2 * D * 4                 # gamma/beta/bq/bk/bv
    live = 6 * blk + 2 * S * S * 4       # x/xn/q/k/v + per-head logits/exp
    return io + weights + vecs + live


def _choose_block_batch(B, S, D, budget_bytes=12 << 20):
    """Largest divisor of B that fits the VMEM budget, respects the (8,128)
    sublane rule on the (bt*S, D) block, and (when possible) leaves >= 2 grid
    steps so v7x's two TensorCores both get work."""
    cands = []
    for bt in range(1, B + 1):
        if B % bt:
            continue
        if (bt * S) % 8 != 0 and bt != B:     # sublane alignment of block
            continue
        if _vmem_bytes(bt, S, D) > budget_bytes:
            continue
        cands.append(bt)
    if not cands:
        return 1 if (S % 8 == 0 or B == 1) else B
    multi = [bt for bt in cands if bt <= B // 2] if B >= 2 else cands
    return max(multi or cands)


def vit_block(x, params, *, n_heads, block_batch=None):
    """x: (B, S, D) float32. params: dict of per-head weights (PyTorch layout)."""
    B, S, D = x.shape
    assert D % n_heads == 0, f"Can't divide dimension {D} into {n_heads} heads"
    d_head = D // n_heads
    bt = block_batch or _choose_block_batch(B, S, D)
    assert B % bt == 0
    rows = bt * S

    # Host-side packing: fused block-diagonal projection weights (bf16 MXU
    # operands), 1/sqrt(d_head) folded into Wq/bq, biases kept f32.
    scale = 1.0 / math.sqrt(d_head)
    wq = (_block_diag(params["wq"]) * scale).astype(jnp.bfloat16)
    wk = _block_diag(params["wk"]).astype(jnp.bfloat16)
    wv = _block_diag(params["wv"]).astype(jnp.bfloat16)
    bq = (params["bq"].reshape(1, D) * scale).astype(jnp.float32)
    bk = params["bk"].reshape(1, D).astype(jnp.float32)
    bv = params["bv"].reshape(1, D).astype(jnp.float32)

    kernel = functools.partial(_vit_block_kernel, n_rows=bt, seq_len=S,
                               n_heads=n_heads, d_head=d_head, eps=1e-5)

    rep = lambda shape: pl.BlockSpec(shape, lambda i: (0,) * len(shape))

    vmem_limit = int(min(48 << 20, max(16 << 20, 2 * _vmem_bytes(bt, S, D))))

    out_flat = pl.pallas_call(
        kernel,
        out_shape=jax.ShapeDtypeStruct((B * S, D), x.dtype),
        grid_spec=pltpu.PrefetchScalarGridSpec(
            num_scalar_prefetch=0,
            grid=(B // bt,),
            in_specs=[
                pl.BlockSpec((rows, D), lambda i: (i, 0)),   # x (flattened slab)
                rep((1, D)), rep((1, D)),                    # ln gamma, beta
                rep((D, D)), rep((D, D)), rep((D, D)),       # Wq/Wk/Wv (block-diag, bf16)
                rep((1, D)), rep((1, D)), rep((1, D)),       # bq/bk/bv
            ],
            out_specs=pl.BlockSpec((rows, D), lambda i: (i, 0)),
        ),
        compiler_params=pltpu.CompilerParams(
            dimension_semantics=("parallel",),
            vmem_limit_bytes=vmem_limit),
    )(x.reshape(B * S, D), params["gamma"], params["beta"],
      wq, wk, wv, bq, bk, bv)

    return out_flat.reshape(B, S, D)


def vit_block_ref(x, params, *, n_heads):
    """Pure-JAX f32 reference mirroring the PyTorch forward."""
    B, S, D = x.shape
    d_head = D // n_heads
    mean = jnp.mean(x, axis=-1, keepdims=True)
    var = jnp.mean((x - mean) ** 2, axis=-1, keepdims=True)
    xn = (x - mean) / jnp.sqrt(var + 1e-5)
    xn = xn * params["gamma"][0] + params["beta"][0]
    outs = []
    for h in range(n_heads):
        seq = xn[:, :, h * d_head:(h + 1) * d_head]
        q = seq @ params["wq"][h] + params["bq"][h]
        k = seq @ params["wk"][h] + params["bk"][h]
        v = seq @ params["wv"][h] + params["bv"][h]
        logits = jnp.einsum("bsd,btd->bst", q, k) / jnp.sqrt(jnp.float32(d_head))
        attn = jax.nn.softmax(logits, axis=-1)
        outs.append(jnp.einsum("bst,btd->bsd", attn, v))
    return x + jnp.concatenate(outs, axis=-1)


if __name__ == "__main__":
    # Small shapes consistent with the module: batch=2, seq=8, hidden_d=32, heads=2.
    B, S, D, H = 2, 8, 32, 2
    d_head = D // H

    key = jax.random.PRNGKey(0)
    ks = jax.random.split(key, 9)
    scale = 1.0 / np.sqrt(d_head)
    params = {
        "gamma": jax.random.normal(ks[0], (1, D), jnp.float32) * 0.1 + 1.0,
        "beta":  jax.random.normal(ks[1], (1, D), jnp.float32) * 0.1,
        "wq": jax.random.uniform(ks[2], (H, d_head, d_head), jnp.float32, -scale, scale),
        "bq": jax.random.uniform(ks[3], (H, 1, d_head), jnp.float32, -scale, scale),
        "wk": jax.random.uniform(ks[4], (H, d_head, d_head), jnp.float32, -scale, scale),
        "bk": jax.random.uniform(ks[5], (H, 1, d_head), jnp.float32, -scale, scale),
        "wv": jax.random.uniform(ks[6], (H, d_head, d_head), jnp.float32, -scale, scale),
        "bv": jax.random.uniform(ks[7], (H, 1, d_head), jnp.float32, -scale, scale),
    }
    x = jax.random.normal(ks[8], (B, S, D), jnp.float32)

    out = vit_block(x, params, n_heads=H)
    out = jax.block_until_ready(out)

    ref = vit_block_ref(x, params, n_heads=H)
    # bf16 MXU operands + approx reciprocal => relaxed tolerance vs f32 ref.
    np.testing.assert_allclose(np.asarray(out), np.asarray(ref), rtol=5e-2, atol=5e-2)

    print("KERNEL_OK")
</pallas_src>

<mosaic_0001>
module attributes {stable_mosaic.version = 11 : i64} {
  func.func @_vit_block_kernel(%arg0: i32, %arg1: memref<8x32xf32, #tpu.memory_space<vmem>>, %arg2: memref<1x32xf32, #tpu.memory_space<vmem>>, %arg3: memref<1x32xf32, #tpu.memory_space<vmem>>, %arg4: memref<32x32xbf16, #tpu.memory_space<vmem>>, %arg5: memref<32x32xbf16, #tpu.memory_space<vmem>>, %arg6: memref<32x32xbf16, #tpu.memory_space<vmem>>, %arg7: memref<1x32xf32, #tpu.memory_space<vmem>>, %arg8: memref<1x32xf32, #tpu.memory_space<vmem>>, %arg9: memref<1x32xf32, #tpu.memory_space<vmem>>, %arg10: memref<8x32xf32, #tpu.memory_space<vmem>>) attributes {dimension_semantics = [#tpu.dimension_semantics<parallel>], iteration_bounds = array<i64: 2>, scalar_prefetch = 0 : i64, scratch_operands = 0 : i64, tpu.core_type = #tpu.core_type<tc>, window_params = [{transform_indices = @transform_0, window_bounds = array<i64: 8, 32>}, {pipeline_mode = #tpu.pipeline_mode<synchronous>, transform_indices = @transform_1, window_bounds = array<i64: 1, 32>}, {pipeline_mode = #tpu.pipeline_mode<synchronous>, transform_indices = @transform_2, window_bounds = array<i64: 1, 32>}, {pipeline_mode = #tpu.pipeline_mode<synchronous>, transform_indices = @transform_3, window_bounds = array<i64: 32, 32>}, {pipeline_mode = #tpu.pipeline_mode<synchronous>, transform_indices = @transform_4, window_bounds = array<i64: 32, 32>}, {pipeline_mode = #tpu.pipeline_mode<synchronous>, transform_indices = @transform_5, window_bounds = array<i64: 32, 32>}, {pipeline_mode = #tpu.pipeline_mode<synchronous>, transform_indices = @transform_6, window_bounds = array<i64: 1, 32>}, {pipeline_mode = #tpu.pipeline_mode<synchronous>, transform_indices = @transform_7, window_bounds = array<i64: 1, 32>}, {pipeline_mode = #tpu.pipeline_mode<synchronous>, transform_indices = @transform_8, window_bounds = array<i64: 1, 32>}, {transform_indices = @transform_9, window_bounds = array<i64: 8, 32>}]} {
    %c0 = arith.constant 0 : index
    %c0_0 = arith.constant 0 : index
    %0 = vector.load %arg2[%c0, %c0_0] : memref<1x32xf32, #tpu.memory_space<vmem>>, vector<1x32xf32>
    %1 = vector.shape_cast %0 : vector<1x32xf32> to vector<32xf32>
    %c0_1 = arith.constant 0 : index
    %c0_2 = arith.constant 0 : index
    %2 = vector.load %arg3[%c0_1, %c0_2] : memref<1x32xf32, #tpu.memory_space<vmem>>, vector<1x32xf32>
    %3 = vector.shape_cast %2 : vector<1x32xf32> to vector<32xf32>
    %c0_3 = arith.constant 0 : index
    %c0_4 = arith.constant 0 : index
    %4 = vector.load %arg7[%c0_3, %c0_4] : memref<1x32xf32, #tpu.memory_space<vmem>>, vector<1x32xf32>
    %5 = vector.shape_cast %4 : vector<1x32xf32> to vector<32xf32>
    %c0_5 = arith.constant 0 : index
    %c0_6 = arith.constant 0 : index
    %6 = vector.load %arg8[%c0_5, %c0_6] : memref<1x32xf32, #tpu.memory_space<vmem>>, vector<1x32xf32>
    %7 = vector.shape_cast %6 : vector<1x32xf32> to vector<32xf32>
    %c0_7 = arith.constant 0 : index
    %c0_8 = arith.constant 0 : index
    %8 = vector.load %arg9[%c0_7, %c0_8] : memref<1x32xf32, #tpu.memory_space<vmem>>, vector<1x32xf32>
    %9 = vector.shape_cast %8 : vector<1x32xf32> to vector<32xf32>
    %c0_9 = arith.constant 0 : index
    %c0_10 = arith.constant 0 : index
    %10 = vector.load %arg1[%c0_9, %c0_10] : memref<8x32xf32, #tpu.memory_space<vmem>>, vector<8x32xf32>
    %cst = arith.constant dense<0.000000e+00> : vector<8xf32>
    %11 = vector.multi_reduction <add>, %10, %cst [1] : vector<8x32xf32> to vector<8xf32>
    %12 = vector.shape_cast %11 : vector<8xf32> to vector<8x1xf32>
    %cst_11 = arith.constant 3.200000e+01 : f32
    %13 = vector.broadcast %cst_11 : f32 to vector<8x1xf32>
    %14 = arith.divf %12, %13 : vector<8x1xf32>
    %15 = vector.broadcast %14 : vector<8x1xf32> to vector<8x32xf32>
    %16 = arith.subf %10, %15 : vector<8x32xf32>
    %17 = arith.mulf %16, %16 : vector<8x32xf32>
    %cst_12 = arith.constant dense<0.000000e+00> : vector<8xf32>
    %18 = vector.multi_reduction <add>, %17, %cst_12 [1] : vector<8x32xf32> to vector<8xf32>
    %19 = vector.shape_cast %18 : vector<8xf32> to vector<8x1xf32>
    %cst_13 = arith.constant 3.200000e+01 : f32
    %20 = vector.broadcast %cst_13 : f32 to vector<8x1xf32>
    %21 = arith.divf %19, %20 : vector<8x1xf32>
    %cst_14 = arith.constant 9.99999974E-6 : f32
    %22 = vector.broadcast %cst_14 : f32 to vector<8x1xf32>
    %23 = arith.addf %21, %22 : vector<8x1xf32>
    %24 = math.rsqrt %23 : vector<8x1xf32>
    %25 = vector.broadcast %24 : vector<8x1xf32> to vector<8x32xf32>
    %26 = arith.mulf %16, %25 : vector<8x32xf32>
    %27 = vector.shape_cast %1 : vector<32xf32> to vector<1x32xf32>
    %28 = vector.broadcast %27 : vector<1x32xf32> to vector<8x32xf32>
    %29 = arith.mulf %26, %28 : vector<8x32xf32>
    %30 = vector.shape_cast %3 : vector<32xf32> to vector<1x32xf32>
    %31 = vector.broadcast %30 : vector<1x32xf32> to vector<8x32xf32>
    %32 = arith.addf %29, %31 : vector<8x32xf32>
    %33 = arith.truncf %32 : vector<8x32xf32> to vector<8x32xbf16>
    %c0_15 = arith.constant 0 : index
    %c0_16 = arith.constant 0 : index
    %34 = vector.load %arg4[%c0_15, %c0_16] : memref<32x32xbf16, #tpu.memory_space<vmem>>, vector<32x32xbf16>
    %cst_17 = arith.constant dense<0.000000e+00> : vector<8x32xf32>
    %35 = tpu.matmul %33, %34, %cst_17 {dimension_numbers = #tpu.dot_dimension_numbers<[1], [0], [0], [1], [0, 0, 1, 1], [], []>} : vector<8x32xbf16>, vector<32x32xbf16>, vector<8x32xf32> -> vector<8x32xf32>
    %36 = vector.shape_cast %5 : vector<32xf32> to vector<1x32xf32>
    %37 = vector.broadcast %36 : vector<1x32xf32> to vector<8x32xf32>
    %38 = arith.addf %35, %37 : vector<8x32xf32>
    %c0_18 = arith.constant 0 : index
    %c0_19 = arith.constant 0 : index
    %39 = vector.load %arg5[%c0_18, %c0_19] : memref<32x32xbf16, #tpu.memory_space<vmem>>, vector<32x32xbf16>
    %cst_20 = arith.constant dense<0.000000e+00> : vector<8x32xf32>
    %40 = tpu.matmul %33, %39, %cst_20 {dimension_numbers = #tpu.dot_dimension_numbers<[1], [0], [0], [1], [0, 0, 1, 1], [], []>} : vector<8x32xbf16>, vector<32x32xbf16>, vector<8x32xf32> -> vector<8x32xf32>
    %41 = vector.shape_cast %7 : vector<32xf32> to vector<1x32xf32>
    %42 = vector.broadcast %41 : vector<1x32xf32> to vector<8x32xf32>
    %43 = arith.addf %40, %42 : vector<8x32xf32>
    %c0_21 = arith.constant 0 : index
    %c0_22 = arith.constant 0 : index
    %44 = vector.load %arg6[%c0_21, %c0_22] : memref<32x32xbf16, #tpu.memory_space<vmem>>, vector<32x32xbf16>
    %cst_23 = arith.constant dense<0.000000e+00> : vector<8x32xf32>
    %45 = tpu.matmul %33, %44, %cst_23 {dimension_numbers = #tpu.dot_dimension_numbers<[1], [0], [0], [1], [0, 0, 1, 1], [], []>} : vector<8x32xbf16>, vector<32x32xbf16>, vector<8x32xf32> -> vector<8x32xf32>
    %46 = vector.shape_cast %9 : vector<32xf32> to vector<1x32xf32>
    %47 = vector.broadcast %46 : vector<1x32xf32> to vector<8x32xf32>
    %48 = arith.addf %45, %47 : vector<8x32xf32>
    %49 = arith.truncf %38 : vector<8x32xf32> to vector<8x32xbf16>
    %50 = arith.truncf %43 : vector<8x32xf32> to vector<8x32xbf16>
    %51 = arith.truncf %48 : vector<8x32xf32> to vector<8x32xbf16>
    %52 = vector.extract_strided_slice %49 {offsets = [0, 0], sizes = [8, 16], strides = [1, 1]} : vector<8x32xbf16> to vector<8x16xbf16>
    %53 = vector.extract_strided_slice %50 {offsets = [0, 0], sizes = [8, 16], strides = [1, 1]} : vector<8x32xbf16> to vector<8x16xbf16>
    %54 = vector.extract_strided_slice %51 {offsets = [0, 0], sizes = [8, 16], strides = [1, 1]} : vector<8x32xbf16> to vector<8x16xbf16>
    %cst_24 = arith.constant dense<0.000000e+00> : vector<8x8xf32>
    %55 = tpu.matmul %52, %53, %cst_24 {dimension_numbers = #tpu.dot_dimension_numbers<[1], [1], [0], [0], [0, 0, 1, 0], [], []>} : vector<8x16xbf16>, vector<8x16xbf16>, vector<8x8xf32> -> vector<8x8xf32>
    %cst_25 = arith.constant dense<0xFF800000> : vector<8xf32>
    %56 = vector.multi_reduction <maximumf>, %55, %cst_25 [1] : vector<8x8xf32> to vector<8xf32>
    %57 = vector.shape_cast %56 : vector<8xf32> to vector<8x1xf32>
    %58 = vector.broadcast %57 : vector<8x1xf32> to vector<8x8xf32>
    %59 = arith.subf %55, %58 : vector<8x8xf32>
    %60 = math.exp %59 : vector<8x8xf32>
    %cst_26 = arith.constant dense<0.000000e+00> : vector<8xf32>
    %61 = vector.multi_reduction <add>, %60, %cst_26 [1] : vector<8x8xf32> to vector<8xf32>
    %62 = vector.shape_cast %61 : vector<8xf32> to vector<8x1xf32>
    %63 = tpu.reciprocal %62 {approx = true} : vector<8x1xf32> -> vector<8x1xf32>
    %64 = vector.broadcast %63 : vector<8x1xf32> to vector<8x8xf32>
    %65 = arith.mulf %60, %64 : vector<8x8xf32>
    %66 = arith.truncf %65 : vector<8x8xf32> to vector<8x8xbf16>
    %cst_27 = arith.constant dense<0.000000e+00> : vector<8x16xf32>
    %67 = tpu.matmul %66, %54, %cst_27 {dimension_numbers = #tpu.dot_dimension_numbers<[1], [0], [0], [1], [0, 0, 1, 1], [], []>} : vector<8x8xbf16>, vector<8x16xbf16>, vector<8x16xf32> -> vector<8x16xf32>
    %68 = vector.extract_strided_slice %49 {offsets = [0, 16], sizes = [8, 16], strides = [1, 1]} : vector<8x32xbf16> to vector<8x16xbf16>
    %69 = vector.extract_strided_slice %50 {offsets = [0, 16], sizes = [8, 16], strides = [1, 1]} : vector<8x32xbf16> to vector<8x16xbf16>
    %70 = vector.extract_strided_slice %51 {offsets = [0, 16], sizes = [8, 16], strides = [1, 1]} : vector<8x32xbf16> to vector<8x16xbf16>
    %cst_28 = arith.constant dense<0.000000e+00> : vector<8x8xf32>
    %71 = tpu.matmul %68, %69, %cst_28 {dimension_numbers = #tpu.dot_dimension_numbers<[1], [1], [0], [0], [0, 0, 1, 0], [], []>} : vector<8x16xbf16>, vector<8x16xbf16>, vector<8x8xf32> -> vector<8x8xf32>
    %cst_29 = arith.constant dense<0xFF800000> : vector<8xf32>
    %72 = vector.multi_reduction <maximumf>, %71, %cst_29 [1] : vector<8x8xf32> to vector<8xf32>
    %73 = vector.shape_cast %72 : vector<8xf32> to vector<8x1xf32>
    %74 = vector.broadcast %73 : vector<8x1xf32> to vector<8x8xf32>
    %75 = arith.subf %71, %74 : vector<8x8xf32>
    %76 = math.exp %75 : vector<8x8xf32>
    %cst_30 = arith.constant dense<0.000000e+00> : vector<8xf32>
    %77 = vector.multi_reduction <add>, %76, %cst_30 [1] : vector<8x8xf32> to vector<8xf32>
    %78 = vector.shape_cast %77 : vector<8xf32> to vector<8x1xf32>
    %79 = tpu.reciprocal %78 {approx = true} : vector<8x1xf32> -> vector<8x1xf32>
    %80 = vector.broadcast %79 : vector<8x1xf32> to vector<8x8xf32>
    %81 = arith.mulf %76, %80 : vector<8x8xf32>
    %82 = arith.truncf %81 : vector<8x8xf32> to vector<8x8xbf16>
    %cst_31 = arith.constant dense<0.000000e+00> : vector<8x16xf32>
    %83 = tpu.matmul %82, %70, %cst_31 {dimension_numbers = #tpu.dot_dimension_numbers<[1], [0], [0], [1], [0, 0, 1, 1], [], []>} : vector<8x8xbf16>, vector<8x16xbf16>, vector<8x16xf32> -> vector<8x16xf32>
    %84 = tpu.concatenate %67, %83 in 1 : vector<8x16xf32>, vector<8x16xf32> -> vector<8x32xf32>
    %c0_32 = arith.constant 0 : index
    %c0_33 = arith.constant 0 : index
    %85 = vector.load %arg1[%c0_32, %c0_33] : memref<8x32xf32, #tpu.memory_space<vmem>>, vector<8x32xf32>
    %86 = arith.addf %85, %84 : vector<8x32xf32>
    %c0_34 = arith.constant 0 : index
    %c0_35 = arith.constant 0 : index
    %87 = vector.load %arg10[%c0_34, %c0_35] : memref<8x32xf32, #tpu.memory_space<vmem>>, vector<8x32xf32>
    tpu.vector_store %arg10[%c0_34, %c0_35], %86 {strides = array<i32>} : memref<8x32xf32, #tpu.memory_space<vmem>>, vector<8x32xf32>,
    return
  }
  func.func @transform_0(%arg0: i32) -> (i32, i32) {
    %c0_i32 = arith.constant 0 : i32
    %c0_i32_0 = arith.constant 0 : i32
    return %arg0, %c0_i32 : i32, i32
  }
  func.func @transform_1(%arg0: i32) -> (i32, i32) {
    %c0_i32 = arith.constant 0 : i32
    %c0_i32_0 = arith.constant 0 : i32
    %c0_i32_1 = arith.constant 0 : i32
    return %c0_i32, %c0_i32_0 : i32, i32
  }
  func.func @transform_2(%arg0: i32) -> (i32, i32) {
    %c0_i32 = arith.constant 0 : i32
    %c0_i32_0 = arith.constant 0 : i32
    %c0_i32_1 = arith.constant 0 : i32
    return %c0_i32, %c0_i32_0 : i32, i32
  }
  func.func @transform_3(%arg0: i32) -> (i32, i32) {
    %c0_i32 = arith.constant 0 : i32
    %c0_i32_0 = arith.constant 0 : i32
    %c0_i32_1 = arith.constant 0 : i32
    return %c0_i32, %c0_i32_0 : i32, i32
  }
  func.func @transform_4(%arg0: i32) -> (i32, i32) {
    %c0_i32 = arith.constant 0 : i32
    %c0_i32_0 = arith.constant 0 : i32
    %c0_i32_1 = arith.constant 0 : i32
    return %c0_i32, %c0_i32_0 : i32, i32
  }
  func.func @transform_5(%arg0: i32) -> (i32, i32) {
    %c0_i32 = arith.constant 0 : i32
    %c0_i32_0 = arith.constant 0 : i32
    %c0_i32_1 = arith.constant 0 : i32
    return %c0_i32, %c0_i32_0 : i32, i32
  }
  func.func @transform_6(%arg0: i32) -> (i32, i32) {
    %c0_i32 = arith.constant 0 : i32
    %c0_i32_0 = arith.constant 0 : i32
    %c0_i32_1 = arith.constant 0 : i32
    return %c0_i32, %c0_i32_0 : i32, i32
  }
  func.func @transform_7(%arg0: i32) -> (i32, i32) {
    %c0_i32 = arith.constant 0 : i32
    %c0_i32_0 = arith.constant 0 : i32
    %c0_i32_1 = arith.constant 0 : i32
    return %c0_i32, %c0_i32_0 : i32, i32
  }
  func.func @transform_8(%arg0: i32) -> (i32, i32) {
    %c0_i32 = arith.constant 0 : i32
    %c0_i32_0 = arith.constant 0 : i32
    %c0_i32_1 = arith.constant 0 : i32
    return %c0_i32, %c0_i32_0 : i32, i32
  }
  func.func @transform_9(%arg0: i32) -> (i32, i32) {
    %c0_i32 = arith.constant 0 : i32
    %c0_i32_0 = arith.constant 0 : i32
    return %arg0, %c0_i32 : i32, i32
  }
}

</mosaic_0001>

<bundles_post_ra>
// kernel: tpu_custom_call.1
= control target key start
LH: loop header
LB: loop body
LE: loop exit
PB: predicated region body
PF: predicated region fallthrough
CT: control target
= control target key end

     0   :  { %14 = vsyncpa [#allocation3], 0  ;;  %s1647_s0 = inlined_call_operand.hbm [shape: f32[16,32], index: 0, kind: input, shape index: {}]   ;;  %s1648_s1 = inlined_call_operand.vmem [shape: f32[1,32], index: 1, kind: input, shape index: {}]   ;;  %s1649_s2 = inlined_call_operand.vmem [shape: f32[1,32], index: 2, kind: input, shape index: {}]   ;;  %s1650_s3 = inlined_call_operand.hbm [shape: bf16[32,32], index: 3, kind: input, shape index: {}]   ;;  %s1651_s4 = inlined_call_operand.hbm [shape: bf16[32,32], index: 4, kind: input, shape index: {}]   ;;  %s1652_s5 = inlined_call_operand.vmem [shape: bf16[32,32], index: 5, kind: input, shape index: {}]   ;;  %s1653_s6 = inlined_call_operand.vmem [shape: f32[1,32], index: 6, kind: input, shape index: {}]   ;;  %s1654_s7 = inlined_call_operand.vmem [shape: f32[1,32], index: 7, kind: input, shape index: {}]   ;;  %s1655_s8 = inlined_call_operand.vmem [shape: f32[1,32], index: 8, kind: input, shape index: {}]   ;;  %s1656_s9 = inlined_call_operand.hbm [shape: f32[16,32], index: 9, kind: output, shape index: {}]  }
   0x1   :  { %16 = vsyncpa [#allocation3 + $0x1], 0 }
   0x2   :  { %17 = vsyncpa [#allocation6], 0 }
   0x3   :  { %18 = vsyncpa [#allocation4], 0 }
   0x4   :  { %20 = vsyncpa [#allocation4 + $0x1], 0  ;;  %s1342_s30 = smov 0   ;;  %s1344_s10 = smov 0  }
   0x5   :  { %s1346_s11 = smov 0   ;;  %s1348_s12 = smov 0  }
   0x6 LB: > { %s1363_s13 = sadd.s32 4294967295, %s1280_s12   ;;  %s936_s14 = sadd.s32 4294967294, %s1280_s12   ;;  %s1280_s12 = sphi %s1348_s12, %s1679_s12   ;;  %s1276_s11 = sphi %s1346_s11, %s1678_s11   ;;  %s1272_s10 = sphi %s1344_s10, %s1677_s10   ;;  %s1268_s30 = sphi %s1342_s30, %s1676_s30  }
   0x7   : > { %p46_p0 = scmp.ne.s32.totalorder %s1272_s10, %s1268_s30  ;;  %p1657_p1 = scmp.eq.s32.totalorder %s1363_s13, 0 }
   0x8   : > { %p244_p3 = scmp.eq.s32.totalorder %s936_s14, 1  ;;  %p937_p5 = scmp.ge.s32.totalorder %s1280_s12, 1 }
   0x9   : > { %p1372_p4 = por %p1657_p1, %p46_p0  ;;  %p251_p7 = scmp.lt.s32.totalorder %s1280_s12, 3 }
   0xa   : > { %p1377_p6 = por %p244_p3, %p46_p0  ;;  %s1282_s18 = smov [#allocation5]  }
   0xb   : > { %s1661_s15 = scalar_select %p1372_p4, 1, 0 }
   0xc   : > { %s1662_s16 = scalar_select %p1377_p6, 1, 0 }
   0xd   : > { %p1382_p8 = pnand %p937_p5, %p251_p7  ;;  %s269_s19 = sshll.u32 %s1282_s18, 4  ;;  %s1386_s19 = int_to_ptr.vmem [resolvable:$true] %s269_s19 }
   0xe   : > { %1663 = sst [smem:[#allocation12_spill]] %s1662_s16  ;;  %s1283_s21 = smov [#allocation7]  }
   0xf   : > { %p1047_p9 = pneg %p1382_p8  ;;  %s282_s22 = sshll.u32 %s1283_s21, 4  ;;  %s1397_s22 = int_to_ptr.vmem [resolvable:$true] %s282_s22 }
  0x10   : > { %s1124_s25 = scalar_lea.hbm %s1650_s3, 256 }
  0x11   : > { %p1393_p11 = pnand %p1047_p9, %p1657_p1  ;;  %p1125_p12 = scmp.ne.s32.totalorder %s1650_s3, %s1124_s25 }
  0x12   : > { %p1131_p5 = scmp.lt.u32.totalorder %s1124_s25, %s1650_s3 }
  0x13   : > { %p1126_p13 = pneg %p1393_p11 }
  0x15   : > { %p1127_p0 = pnand %p1126_p13, %p1125_p12 }
  0x17   : > { %p1128_p3 = pneg %p1127_p0 }
  0x19   : > { %p1133_p7 = pnand %p1131_p5, %p1128_p3 }
  0x1b   : > { %1136 = shalt.err (!%p1133_p7)
}
  0x1c   : > { %s1137_s14 = scalar_lea.vmem %s1386_s19, 256  ;;  %p1145_p2 = scmp.lt.s32.totalorder %s1386_s19, %s1386_s19 }
  0x1d   : > { %p1138_p9 = scmp.ne.s32.totalorder %s1386_s19, %s1137_s14  ;;  %p1146_p12 = scmp.lt.s32.totalorder %s1137_s14, %s1137_s14 }
  0x1f   : > { %p1140_p10 = pnand %p1138_p9, %p1126_p13  ;;  %p1147_p0 = por %p1146_p12, %p1145_p2 }
  0x21   : > { %p1141_p1 = pneg %p1140_p10 }
  0x23   : > { %p1148_p6 = pnand %p1147_p0, %p1141_p1 }
  0x25   : > { %1151 = shalt.err (!%p1148_p6)
}
  0x26   : > { %s1284_s18 = smov 64   ;;  %s1285_s21 = smov 4  }
  0x27   : > { %1050 = dma.hbm_to_vmem [thread:$0]  (!%p1393_p11), %s1650_s3, 256, %s1386_s19, [#allocation6], %s1284_s18, %s1284_s18, %s1285_s21  }
  0x28   : > { %s1152_s27 = scalar_lea.hbm %s1651_s4, 256 }
  0x29   : > { %p1153_p2 = scmp.ne.s32.totalorder %s1651_s4, %s1152_s27  ;;  %p1159_p10 = scmp.lt.u32.totalorder %s1152_s27, %s1651_s4 }
  0x2b   : > { %p1155_p1 = pnand %p1153_p2, %p1126_p13 }
  0x2d   : > { %p1156_p6 = pneg %p1155_p1 }
  0x2f   : > { %p1161_p3 = pnand %p1159_p10, %p1156_p6 }
  0x31   : > { %1164 = shalt.err (!%p1161_p3)
}
  0x32   : > { %s1165_s19 = scalar_lea.vmem %s1397_s22, 256  ;;  %p1173_p12 = scmp.lt.s32.totalorder %s1397_s22, %s1397_s22 }
  0x33   : > { %p1166_p5 = scmp.ne.s32.totalorder %s1397_s22, %s1165_s19  ;;  %p1174_p0 = scmp.lt.s32.totalorder %s1165_s19, %s1165_s19 }
  0x35   : > { %p1168_p7 = pnand %p1166_p5, %p1126_p13  ;;  %p1175_p2 = por %p1174_p0, %p1173_p12 }
  0x37   : > { %p1169_p9 = pneg %p1168_p7 }
  0x39   : > { %p1176_p1 = pnand %p1175_p2, %p1169_p9 }
  0x3b   : > { %1179 = shalt.err (!%p1176_p1)
}
  0x3c   : > { %1053 = dma.hbm_to_vmem [thread:$0]  (!%p1393_p11), %s1651_s4, 256, %s1397_s22, [#allocation6], %s1284_s18, %s1284_s18, %s1285_s21  }
  0x3d   : > { %s1452_s24 = sadd.s32 1, %s1280_s12   ;;  %s33_s20 = sadd.s32 1, %s1276_s11 }
  0x3e   : > { %s30_s25 = ssub.s32 %s1280_s12, %s1452_s24  ;;  %p40_p13 = scmp.ne.s32.totalorder %s1276_s11, %s1272_s10 }
  0x3f   : > { %p31_p6 = scmp.eq.s32.totalorder %s30_s25, 0  ;;  %p41_p10 = scmp.eq.s32.totalorder %s1280_s12, 0 }
  0x40   : > { %p1666_p3 = scmp.eq.s32.totalorder %s1363_s13, 1  ;;  %p1064_p7 = scmp.lt.s32.totalorder %s1280_s12, 2 }
  0x41   : > { %s1468_s27 = scalar_select %p31_p6, %s1276_s11, %s33_s20  }
  0x42   : > { %p1462_p5 = por %p1666_p3, %p40_p13  ;;  %p42_p9 = por %p41_p10, %p40_p13 }
  0x43   : > { %s308_s28 = sand.u32 1, %s1276_s11   ;;  %s942_s22 = sshll.u32 %s1280_s12, 7 }
  0x44   : > { %s1667_s26 = scalar_select %p1462_p5, 1, 0 }
  0x45   : > { %s941_s29 = sshll.u32 %s308_s28, 3  ;;  %s1475_s14 = scalar_lea.hbm %s1647_s0, %s942_s22 }
  0x46   : > { %s312_s19 = scalar_lea.vmem [#allocation2], %s941_s29  ;;  %p1479_p11 = pnand %p1064_p7, %p42_p9 }
  0x47   : > { %s319_s16 = sshll.u32 %s312_s19, 4  ;;  %s309_s20 = scalar_lea.sflag [#allocation3], %s308_s28  ;;  %s1477_s16 = int_to_ptr.vmem [resolvable:$true] %s319_s16 }
  0x48   : > { %s1180_s25 = scalar_lea.hbm %s1475_s14, 128  ;;  %p1182_p0 = pneg %p1479_p11 }
  0x49   : > { %p1181_p12 = scmp.ne.s32.totalorder %s1475_s14, %s1180_s25  ;;  %s1185_s18 = scalar_lea.hbm %s1647_s0, 256 }
  0x4a   : > { %p1186_p13 = scmp.lt.u32.totalorder %s1475_s14, %s1647_s0  ;;  %p1187_p6 = scmp.lt.u32.totalorder %s1185_s18, %s1180_s25 }
  0x4b   : > { %p1183_p2 = pnand %p1182_p0, %p1181_p12  ;;  %p1189_p3 = scmp.lt.u32.totalorder %s1180_s25, %s1475_s14 }
  0x4c   : > { %p1188_p10 = por %p1187_p6, %p1186_p13 }
  0x4d   : > { %p1184_p1 = pneg %p1183_p2 }
  0x4e   : > { %p1190_p7 = por %p1189_p3, %p1188_p10 }
  0x50   : > { %p1191_p9 = pnand %p1190_p7, %p1184_p1 }
  0x52   : > { %1194 = shalt.err (!%p1191_p9)
}
  0x53   : > { %s1195_s28 = scalar_lea.vmem %s1477_s16, 128  ;;  %s1286_s22 = smov [#allocation2]  }
  0x54   : > { %p1196_p12 = scmp.ne.s32.totalorder %s1477_s16, %s1195_s28  ;;  %s1200_s29 = sshll.u32 %s1286_s22, 4  ;;  %s1201_s29 = int_to_ptr.vmem [resolvable:$false] %s1200_s29 }
  0x55   : > { %s1202_s21 = scalar_lea.vmem %s1201_s29, 256  ;;  %p1203_p4 = scmp.lt.s32.totalorder %s1477_s16, %s1201_s29 }
  0x56   : > { %p1198_p2 = pnand %p1196_p12, %p1182_p0  ;;  %p1204_p13 = scmp.lt.s32.totalorder %s1202_s21, %s1195_s28 }
  0x58   : > { %p1199_p5 = pneg %p1198_p2  ;;  %p1205_p6 = por %p1204_p13, %p1203_p4 }
  0x5a   : > { %p1206_p10 = pnand %p1205_p6, %p1199_p5 }
  0x5c   : > { %1209 = shalt.err (!%p1206_p10)
}
  0x5d   : > { %1057 = dma.hbm_to_vmem [thread:$0]  (!%p1479_p11), %s1475_s14, 128, %s1477_s16, %s309_s20  }
  0x5e   : > { %328 = sbr.rel (%p1382_p8) target bundleno = 1632 (0x660), region = 56  ;;  %s1511_s25 = sand.u32 (!%p1382_p8), 1, %s1272_s10  }
  0x5f   : > { %s944_s18 = sshll.u32 (!%p1382_p8), %s1511_s25, 3  ;;  %s331_s19 = scalar_lea.sflag (!%p1382_p8), [#allocation3], %s1511_s25 }
  0x60   : > { %s334_s28 = scalar_lea.vmem (!%p1382_p8), [#allocation2], %s944_s18  ;;  %p1669_p4 = scmp.ne.s32.totalorder (!%p1382_p8), %s1661_s15, 0 }
  0x65   : > { %1255 = dma.done.wait (%p1669_p4), %s331_s19, 128  }
  0x66   : > { %1257 = vsyncadd (%p1669_p4), %s331_s19, 4294967168  ;;  %p1670_p5 = scmp.eq.s32.totalorder %s1363_s13, 0 }
  0x68   : > { %1259 = dma.done.wait (%p1670_p5), [#allocation6], 512   ;;  %p1671_p8 = pmov %p1670_p5 }
  0x69   : > { %vm384_vm0 = vcmask 261120   ;;  %v1525_v0 = vld [vmem:[%s334_s28] sm:$0xff]  ;;  %v1108_v7 = vld [vmem:[#allocation5] sm:$0xff]   ;;  %v1287_v9 = vmov 0.0   ;;  %v1110_v10 = vld [vmem:[#allocation5 + $0x8] sm:$0xff]   ;;  %vm1288_vm1 = vmmov 0  }
  0x6a   : > { %1261 = vsyncadd (%p1671_p8), [#allocation6], 4294966784  ;;  %v385_v1 = vsel %vm384_vm0, %v1525_v0, 0.0  ;;  %v1109_v8 = vld [vmem:[#allocation7] sm:$0xff]   ;;  %987 = vmatprep.subr.bf16.mxu0 %v1287_v9  ;;  %995 = vmatprep.subr.bf16.mxu1 %v1287_v9  ;;  %v1111_v11 = vld [vmem:[#allocation7 + $0x8] sm:$0xff]   ;;  %vm606_vm2 = vcmask 130048  }
  0x6b   : > { %386 = vadd.xlane.f32.xlu0 %v385_v1  ;;  %988 = vmatpush3.bf16.msra.mxu0 %v1108_v7  ;;  %v948_v16 = vld [vmem:[%s1648_s1] ss:$0 sm:$0xff]  ;;  %v1113_v23 = vld [vmem:[%s1652_s5 + $0x8] sm:$0xff]   ;;  %s1289_s17 = smov 112   ;;  %vm669_vm3 = vcmask 1043456   ;;  %vm653_vm4 = vcmask 64512  }
  0x6c   : > { %996 = vmatpush3.bf16.msra.mxu1 %v1109_v8  ;;  %989 = vmatprep.subr.bf16.mxu0 %v1287_v9  ;;  %v949_v18 = vld [vmem:[%s1649_s2] ss:$0 sm:$0xff]  ;;  %s1290_s23 = smov 16   ;;  %s967_s20 = sshll.u32 %s1363_s13, 7 }
  0x6d   : > { %997 = vmatprep.subr.bf16.mxu1 %v1287_v9  ;;  %991 = vmatprep.mubr.msk.bf16.mxu0 %vm1288_vm1, %v1287_v9  ;;  %v1112_v21 = vld [vmem:[%s1652_s5] sm:$0xff]   ;;  %s376_s22 = scalar_lea.vmem [#allocation8], %s944_s18  ;;  %s1602_s28 = scalar_lea.hbm %s1656_s9, %s967_s20 }
  0x6e   : > { %999 = vmatprep.mubr.msk.bf16.mxu1 %vm1288_vm1, %v1287_v9  ;;  %v954_v24 = vld [vmem:[%s1654_s7] ss:$0 sm:$0xff]  ;;  %s847_s29 = sshll.u32 %s376_s22, 4  ;;  %s834_s13 = scalar_lea.sflag [#allocation4], %s1511_s25  ;;  %s1604_s29 = int_to_ptr.vmem [resolvable:$true] %s847_s29 }
  0x6f   : > { %990 = vmatpush3.bf16.msra.mxu0 %v1110_v10  ;;  %v950_v25 = vld [vmem:[%s1653_s6] ss:$0 sm:$0xff]  ;;  %s1210_s18 = scalar_lea.vmem %s1604_s29, 128  ;;  %p1672_p0 = scmp.ne.s32.totalorder %s1667_s26, 0 }
  0x70   : > { %998 = vmatpush3.bf16.msra.mxu1 %v1111_v11  ;;  %1003 = vmatprep.subr.bf16.mxu0 %v1287_v9  ;;  %v958_v38 = vld [vmem:[%s1655_s8] ss:$0 sm:$0xff]  ;;  %p1211_p11 = scmp.ne.s32.totalorder %s1604_s29, %s1210_s18  ;;  %s1291_s15 = smov [#allocation8]  }
  0x71   : > { %1011 = vmatprep.subr.bf16.mxu1 %v1287_v9 }
  0x72   : > { %p1212_p1 = pnand %p1211_p11, %p1672_p0 }
  0x74   : > { %p1213_p3 = pneg %p1212_p1 }
  0xf8   : > { %v387_v2 = vpop.xlane.xlu0 %386 }
  0xf9   : > { %v389_v3 = vmul.f32 0.03125, %v387_v2 }
  0xfb   : > { %v390_v4 = vsub.f32 %v1525_v0, %v389_v3 }
  0xfd   : > { %v391_v5 = vmul.f32 %v390_v4, %v390_v4 }
  0xff   : > { %v392_v6 = vsel %vm384_vm0, %v391_v5, 0.0 }
 0x100   : > { %393 = vadd.xlane.f32.xlu0 %v392_v6 }
 0x18d   : > { %v394_v12 = vpop.xlane.xlu0 %393 }
 0x18e   : > { %v395_v13 = vmul.f32 0.03125, %v394_v12 }
 0x190   : > { %v396_v14 = vadd.f32 1e-05, %v395_v13 }
 0x192   : > { %1114 = vrsqrt.f32 %v396_v14 }
 0x19c   : > { %v1115_v15 = vpop.eup %1114 }
 0x19d   : > { %v398_v17 = vmul.f32 %v1115_v15, %v390_v4 }
 0x19f   : > { %v405_v19 = vmul.f32 %v948_v16, %v398_v17 }
 0x1a1   : > { %v412_v20 = vadd.f32 %v949_v18, %v405_v19 }
 0x1a3   : > { %v413_v22 = vpack.c.bf16 %v412_v20, %v412_v20 }
 0x1a5   : > { %992 = vmatmul.mubr.msk.bf16.vlgmr.msra.gmra.mrb[0].mxu0 %vm384_vm0, %v413_v22  ;;  %1000 = vmatmul.mubr.msk.bf16.vlgmr.msra.gmra.mrb[0].mxu1 %vm384_vm0, %v413_v22 }
 0x1a6   : > { %1004 = vmatpush3.bf16.msra.mxu0 %v1112_v21  ;;  %1007 = vmatprep.mubr.msk.bf16.mxu0 %vm1288_vm1, %v1287_v9 }
 0x1a7   : > { %1005 = vmatprep.subr.bf16.mxu0 %v1287_v9  ;;  %1013 = vmatprep.mubr.msk.bf16.mxu1 %vm1288_vm1, %v1287_v9 }
 0x1aa   : > { %1006 = vmatpush3.bf16.msra.mxu0 %v1113_v23 }
 0x1ab   : > { %1017 = vmatprep.subr.bf16.mxu0 %v1287_v9 }
 0x1ad   : > { %1008 = vmatmul.mubr.msk.bf16.vlgmr.msra.gmra.mrb[4].mxu0 %vm384_vm0, %v413_v22 }
 0x1ae   : > { %1019 = vmatprep.mubr.msk.bf16.mxu0 %vm1288_vm1, %v1287_v9 }
 0x278   : > { %v473_v26 = vpop.f32.mrb[0].mxu0  ;;  %v535_v27 = vpop.f32.mrb[0].mxu1 }
 0x279   : > { %v536_v28 = vadd.f32 %v954_v24, %v535_v27  ;;  %v993_v29 = vpop.f32.mrb[1].mxu0  ;;  %v1001_v30 = vpop.f32.mrb[1].mxu1  ;;  %v474_v33 = vadd.f32 %v950_v25, %v473_v26 }
 0x27a   : > { %v476_v31 = vpop.f32.mrb[2].mxu0  ;;  %v538_v32 = vpop.f32.mrb[2].mxu1 }
 0x27b   : > { %v604_v34 = vpack.c.bf16 %v536_v28, %v536_v28  ;;  %v994_v35 = vpop.f32.mrb[3].mxu0  ;;  %v1002_v36 = vpop.f32.mrb[3].mxu1  ;;  %v603_v39 = vpack.c.bf16 %v474_v33, %v474_v33 }
 0x27d   : > { %v611_v37 = vsel %vm606_vm2, %v604_v34, 0  ;;  %717 = vrot.lane.b32.xlu1 %v604_v34, %s1289_s17 }
 0x27e   : > { %1012 = vmatpush3.bf16.xpose.msra.mxu1 %v611_v37 }
 0x27f   : > { %1023 = vmatprep.subr.bf16.mxu1 %v1287_v9 }
 0x280   : > { %v597_v40 = vpop.f32.mrb[4].mxu0 }
 0x281   : > { %v598_v41 = vadd.f32 %v958_v38, %v597_v40  ;;  %714 = vrot.lane.b32.xlu1 %v603_v39, %s1289_s17  ;;  %v1009_v42 = vpop.f32.mrb[5].mxu0 }
 0x282   : > { %v600_v43 = vpop.f32.mrb[6].mxu0 }
 0x283   : > { %v605_v44 = vpack.c.bf16 %v598_v41, %v598_v41  ;;  %v1010_v45 = vpop.f32.mrb[7].mxu0 }
 0x285   : > { %v671_v46 = vsel %vm669_vm3, %v605_v44, 0  ;;  %1014 = vmatmul.mubr.msk.bf16.vlgmr.msra.gmra.mrb[4].mxu1 %vm606_vm2, %v603_v39 }
 0x286   : > { %1018 = vmatpush3.bf16.msra.mxu0 %v671_v46  ;;  %1025 = vmatprep.mubr.msk.bf16.mxu1 %vm1288_vm1, %v1287_v9 }
 0x287   : > { %1029 = vmatprep.subr.bf16.mxu0 %v1287_v9 }
 0x2ef   : > { %v718_v47 = vpop.permute.xlu1 %717 }
 0x2f0   : > { %v723_v48 = vsel %vm606_vm2, %v718_v47, 0 }
 0x2f1   : > { %1024 = vmatpush3.bf16.xpose.msra.mxu1 %v723_v48 }
 0x2f3   : > { %v715_v49 = vpop.permute.xlu1 %714 }
 0x2f8   : > { %1026 = vmatmul.mubr.msk.bf16.vlgmr.msra.gmra.mrb[8].mxu1 %vm606_vm2, %v715_v49 }
 0x358   : > { %v647_v50 = vpop.f32.mrb[4].mxu1 }
 0x359   : > { %v1015_v51 = vpop.f32.mrb[5].mxu1  ;;  %v654_v52 = vsel %vm653_vm4, %v647_v50, -inf }
 0x35a   : > { %655 = vmax.xlane.f32.xlu0 %v654_v52  ;;  %v650_v53 = vpop.f32.mrb[6].mxu1 }
 0x35b   : > { %v1016_v54 = vpop.f32.mrb[7].mxu1 }
 0x3cb   : > { %v759_v55 = vpop.f32.mrb[8].mxu1 }
 0x3cc   : > { %v1027_v56 = vpop.f32.mrb[9].mxu1  ;;  %v765_v57 = vsel %vm653_vm4, %v759_v55, -inf }
 0x3cd   : > { %766 = vmax.xlane.f32.xlu1 %v765_v57  ;;  %v762_v58 = vpop.f32.mrb[10].mxu1 }
 0x3ce   : > { %v1028_v59 = vpop.f32.mrb[11].mxu1 }
 0x3e7   : > { %v656_v60 = vpop.xlane.xlu0 %655 }
 0x3e8   : > { %v657_v61 = vsub.f32 %v647_v50, %v656_v60 }
 0x3ea   : > { %v658_v62 = vmul.f32 1.442695, %v657_v61 }
 0x3ec   : > { %1116 = vpow2.f32 %v658_v62 }
 0x3f6   : > { %v1117_v63 = vpop.eup %1116 }
 0x3f7   : > { %v660_v1 = vsel %vm653_vm4, %v1117_v63, 0.0 }
 0x3f8   : > { %661 = vadd.xlane.f32.xlu0 %v660_v1 }
 0x45a   : > { %v767_v2 = vpop.xlane.xlu1 %766 }
 0x45b   : > { %v768_v3 = vsub.f32 %v759_v55, %v767_v2 }
 0x45d   : > { %v769_v4 = vmul.f32 1.442695, %v768_v3 }
 0x45f   : > { %1118 = vpow2.f32 %v769_v4 }
 0x469   : > { %v1119_v5 = vpop.eup %1118 }
 0x46a   : > { %v771_v6 = vsel %vm653_vm4, %v1119_v5, 0.0 }
 0x46b   : > { %772 = vadd.xlane.f32.xlu0 %v771_v6 }
 0x481   : > { %778 = vrot.lane.b32.xlu0 %v605_v44, %s1289_s17  ;;  %s1214_s17 = sshll.u32 %s1291_s15, 4  ;;  %s1215_s17 = int_to_ptr.vmem [resolvable:$false] %s1214_s17 }
 0x482   : > { %s1216_s14 = scalar_lea.vmem %s1215_s17, 256  ;;  %p1217_p7 = scmp.lt.s32.totalorder %s1604_s29, %s1215_s17 }
 0x483   : > { %p1218_p9 = scmp.lt.s32.totalorder %s1216_s14, %s1210_s18 }
 0x485   : > { %v662_v7 = vpop.xlane.xlu0 %661  ;;  %p1219_p12 = por %p1218_p9, %p1217_p7 }
 0x486   : > { %1120 = vrcp.f32 %v662_v7 }
 0x487   : > { %p1220_p2 = pnand %p1219_p12, %p1213_p3 }
 0x490   : > { %v1121_v8 = vpop.eup %1120 }
 0x491   : > { %v664_v10 = vmul.f32 %v1121_v8, %v1117_v63 }
 0x493   : > { %v665_v11 = vpack.c.bf16 %v664_v10, %v664_v10 }
 0x495   : > { %1020 = vmatmul.mubr.msk.bf16.vlgmr.msra.gmra.mrb[8].mxu0 %vm653_vm4, %v665_v11 }
 0x496   : > { %1031 = vmatprep.mubr.msk.bf16.mxu0 %vm1288_vm1, %v1287_v9 }
 0x4f8   : > { %v773_v12 = vpop.xlane.xlu0 %772 }
 0x4f9   : > { %1122 = vrcp.f32 %v773_v12 }
 0x4fc   : > { %v779_v13 = vpop.permute.xlu0 %778 }
 0x4fd   : > { %v784_v14 = vsel %vm669_vm3, %v779_v13, 0 }
 0x4fe   : > { %1030 = vmatpush3.bf16.msra.mxu0 %v784_v14 }
 0x503   : > { %v1123_v15 = vpop.eup %1122 }
 0x504   : > { %v775_v16 = vmul.f32 %v1123_v15, %v1119_v5 }
 0x506   : > { %v776_v17 = vpack.c.bf16 %v775_v16, %v775_v16 }
 0x508   : > { %1032 = vmatmul.mubr.msk.bf16.vlgmr.msra.gmra.mrb[12].mxu0 %vm653_vm4, %v776_v17 }
 0x568   : > { %v707_v18 = vpop.f32.mrb[8].mxu0 }
 0x569   : > { %v1021_v19 = vpop.f32.mrb[9].mxu0 }
 0x56a   : > { %v710_v20 = vpop.f32.mrb[10].mxu0 }
 0x56b   : > { %v1022_v21 = vpop.f32.mrb[11].mxu0 }
 0x5db   : > { %v820_v22 = vpop.f32.mrb[12].mxu0 }
 0x5dc   : > { %827 = vrot.lane.b32.xlu0 %v820_v22, %s1290_s23  ;;  %v1033_v9 = vpop.f32.mrb[13].mxu0 }
 0x5dd   : > { %v823_v23 = vpop.f32.mrb[14].mxu0 }
 0x5de   : > { %v1034_v24 = vpop.f32.mrb[15].mxu0 }
 0x64e   : > { %v828_v25 = vpop.permute.xlu0 %827 }
 0x64f   : > { %v830_v26 = vsel %vm606_vm2, %v707_v18, %v828_v25 }
 0x650   : > { %v831_v27 = vadd.f32 %v830_v26, %v1525_v0 }
 0x652   : > { %832 = vst.msk [vmem:[%s376_s22] sm:$0xff] %vm384_vm0, %v831_v27 }
 0x653   : > { %1223 = shalt.err (!%p1220_p2)
}
 0x654   : > { %s1224_s25 = scalar_lea.hbm %s1602_s28, 128  ;;  %s1228_s20 = scalar_lea.hbm %s1656_s9, 256 }
 0x655   : > { %p1225_p13 = scmp.ne.s32.totalorder %s1602_s28, %s1224_s25  ;;  %p1229_p4 = scmp.lt.u32.totalorder %s1602_s28, %s1656_s9 }
 0x656   : > { %p1230_p5 = scmp.lt.u32.totalorder %s1228_s20, %s1224_s25  ;;  %p1232_p11 = scmp.lt.u32.totalorder %s1224_s25, %s1602_s28 }
 0x657   : > { %p1226_p6 = pnand %p1225_p13, %p1672_p0 }
 0x658   : > { %p1231_p8 = por %p1230_p5, %p1229_p4 }
 0x659   : > { %p1227_p10 = pneg %p1226_p6 }
 0x65a   : > { %p1233_p1 = por %p1232_p11, %p1231_p8 }
 0x65c   : > { %p1234_p3 = pnand %p1233_p1, %p1227_p10 }
 0x65e   : > { %1237 = shalt.err (!%p1234_p3)
}
 0x65f   : > { %1045 = dma.vmem_to_hbm [thread:$0]  (%p1672_p0), %s1604_s29, 128, %s1602_s28, %s834_s13  }
 0x660 PF: > { %s1673_s19 = sld [smem:[#allocation12_spill]]  ;;  %s859_s18 = sand.u32 1, %s1268_s30  }
 0x661   : > { %p1675_p9 = scmp.ge.s32.totalorder %s1280_s12, 2  ;;  %s860_s15 = scalar_lea.sflag [#allocation4], %s859_s18 }
 0x666   : > { %p1674_p7 = scmp.ne.s32.totalorder %s1673_s19, 0 }
 0x668   : > { %p1059_p12 = pnand %p1675_p9, %p1674_p7 }
 0x66a   : > { %1263 = dma.done.wait (!%p1059_p12), %s860_s15, 128  }
 0x66b   : > { %1265 = vsyncadd (!%p1059_p12), %s860_s15, 4294967168  ;;  %p23_p2 = scmp.ge.s32.totalorder %s1452_s24, 4   ;;  %s1676_s30 = smov %s1272_s10 }
 0x66c   : > { %s1677_s10 = smov %s1276_s11  ;;  %s1678_s11 = smov %s1468_s27 }
 0x66d   : > { %s1679_s12 = smov %s1452_s24  ;;  %25 = sbr.rel (!%p23_p2) target bundleno = 6 (0x6), region = 109 }
 0x674   :  { %865 = vsyncpa [#allocation3], 1 }
 0x675   :  { %867 = vsyncpa [#allocation3 + $0x1], 1 }
 0x676   :  { %868 = vsyncpa [#allocation6], 1 }
 0x677   :  { %869 = vsyncpa [#allocation4], 1 }
 0x678   :  { %871 = vsyncpa [#allocation4 + $0x1], 1 }

</bundles_post_ra>
